<compile_context>
chip_gen: v5e
topology: v5e:2x2
jax: 0.10.0
libtpu: 0.0.40
codegen_flags: <defaults>
</compile_context>

<pallas_src>
import functools

import jax
import jax.numpy as jnp
from jax.experimental import pallas as pl
from jax.experimental.pallas import tpu as pltpu

HIDDEN = 32
LAYERS = 2
MAX_SEQ_LEN = 4
NUM_VOCAB = 10
EPS = 0.0                       # GIN eps (train_eps=False -> 0)
PRED_PAD = 128                  # MAX_SEQ_LEN * NUM_VOCAB = 40 -> 128 lanes

# vocab sizes of the (synthetic) node / edge encoders
NUM_NODE_TYPES = 5
NUM_NODE_ATTRS = 7
MAX_DEPTH = 10
NUM_EDGE_TYPES = 3
NUM_EDGE_ATTRS = 2

# ---- packed weight-slab layout (every segment starts on a 16-row boundary
#      so all in-kernel ref slices are sublane-aligned for bf16) ------------
NODE_TAB_ROWS = NUM_NODE_TYPES + NUM_NODE_ATTRS + MAX_DEPTH      # 22
NODE_TAB_PAD = 32
EDGE_TAB_ROWS = NUM_EDGE_TYPES + NUM_EDGE_ATTRS                  # 5
EDGE_TAB_PAD = 16
EDGE_TAB_OFF = NODE_TAB_PAD                                      # 32
MLP_OFF = EDGE_TAB_OFF + LAYERS * EDGE_TAB_PAD                   # 64
MLP_BLK = 48                                                     # H+1=33 -> 48
W_ROWS = MLP_OFF + 2 * LAYERS * MLP_BLK                          # 256


# ---------------------------------------------------------------------------
# Fully fused Net.forward kernel (single program, no grid)
# ---------------------------------------------------------------------------
def net_fused_kernel(idx_sub_ref, idx_lane_ref, w_ref, pred_ref, out_ref,
                     *, n_nodes, n_edges):
    N, E, H = n_nodes, n_edges, HIDDEN
    B = out_ref.shape[0]
    f32, bf16 = jnp.float32, jnp.bfloat16

    def onehot(mask):            # bool -> exact bf16 one-hot (via f32 convert)
        return mask.astype(f32).astype(bf16)

    # ---- node encoder: one one-hot matmul over the stacked
    #      [type | attr | depth] embedding table (rows 0..21 of w_ref) ------
    n_type = idx_sub_ref[0:N, 0:1]
    n_attr = idx_sub_ref[0:N, 1:2]
    n_dep = idx_sub_ref[0:N, 2:3]
    it_n = jax.lax.broadcasted_iota(jnp.int32, (N, NODE_TAB_ROWS), 1)
    node_oh = onehot((it_n == n_type)
                     | (it_n == n_attr + NUM_NODE_TYPES)
                     | (it_n == n_dep + NUM_NODE_TYPES + NUM_NODE_ATTRS))
    h = jnp.dot(node_oh, w_ref[0:NODE_TAB_ROWS, :],
                preferred_element_type=f32)                       # (N,H) f32

    # ---- graph-structure one-hots, built once and reused by both layers ---
    src = idx_sub_ref[0:E, 3:4]                                   # (E,1)
    gath = onehot(jax.lax.broadcasted_iota(jnp.int32, (E, N), 1) == src)
    dst = idx_lane_ref[0:1, 0:E]                                  # (1,E)
    scat = onehot(jax.lax.broadcasted_iota(jnp.int32, (N, E), 0) == dst)

    e_type = idx_sub_ref[0:E, 4:5]
    e_attr = idx_sub_ref[0:E, 5:6]
    it_e = jax.lax.broadcasted_iota(jnp.int32, (E, EDGE_TAB_ROWS), 1)
    edge_oh = onehot((it_e == e_type) | (it_e == e_attr + NUM_EDGE_TYPES))

    # ---- GIN layers (static unroll; bf16 MXU operands, f32 accumulation,
    #      all elementwise math kept in f32) --------------------------------
    for l in range(LAYERS):
        eoff = EDGE_TAB_OFF + l * EDGE_TAB_PAD
        eemb = jnp.dot(edge_oh, w_ref[eoff:eoff + EDGE_TAB_ROWS, :],
                       preferred_element_type=f32)                # (E,H)
        x_src = jnp.dot(gath, h.astype(bf16),
                        preferred_element_type=f32)               # (E,H)
        msg = jnp.maximum(x_src + eemb, 0.0)
        agg = jnp.dot(scat, msg.astype(bf16),
                      preferred_element_type=f32)                 # (N,H)
        z = (1.0 + EPS) * h + agg

        woff1 = MLP_OFF + (2 * l) * MLP_BLK
        woff2 = MLP_OFF + (2 * l + 1) * MLP_BLK
        h1 = jnp.maximum(
            jnp.dot(z.astype(bf16), w_ref[woff1:woff1 + H, :],
                    preferred_element_type=f32)
            + w_ref[woff1 + H:woff1 + H + 1, :], 0.0)
        h = (jnp.dot(h1.astype(bf16), w_ref[woff2:woff2 + H, :],
                     preferred_element_type=f32)
             + w_ref[woff2 + H:woff2 + H + 1, :])

    # JK='last' -> h ; dropout (eval) -> identity.

    # ---- global_mean_pool: sum-pool matmul, then EUP reciprocal scale -----
    bat = idx_lane_ref[1:2, 0:N]                                  # (1,N)
    pool_f32 = (jax.lax.broadcasted_iota(jnp.int32, (B, N), 0) == bat).astype(f32)
    counts = jnp.maximum(jnp.sum(pool_f32, axis=1, keepdims=True), 1.0)
    inv = pl.reciprocal(counts, approx=True)                      # (B,1)
    hg = jnp.dot(pool_f32.astype(bf16), h.astype(bf16),
                 preferred_element_type=f32) * inv                # (B,H)

    # ---- all max_seq_len heads fused into one lane-dense (B,128) store ----
    out_ref[...] = (jnp.dot(hg.astype(bf16), pred_ref[0:H, :],
                            preferred_element_type=f32)
                    + pred_ref[H:H + 1, :])


# ---------------------------------------------------------------------------
# Net.forward wrapper: pack per-call int indices + one fused pallas_call
# ---------------------------------------------------------------------------
@functools.partial(jax.jit, static_argnums=(6,))
def net_forward(packed, x, edge_index, edge_attr, node_depth, batch, num_graphs):
    N = x.shape[0]
    E = edge_index.shape[1]
    M = max(N, E)

    depth = jnp.clip(node_depth.reshape(-1), 0, MAX_DEPTH - 1)

    def col(v, n):
        return jnp.pad(v.astype(jnp.int32), (0, M - n))

    zeros = jnp.zeros((M,), jnp.int32)
    # one sublane-oriented and one lane-oriented int32 block instead of six
    # separately padded index operands (fewer DMA descriptors / sem waits)
    idx_sub = jnp.stack(
        [col(x[:, 0], N), col(x[:, 1], N), col(depth, N),
         col(edge_index[0], E), col(edge_attr[:, 0], E), col(edge_attr[:, 1], E),
         zeros, zeros], axis=1)                                    # (M, 8)
    idx_lane = jnp.stack(
        [col(edge_index[1], E), col(batch, N),
         zeros, zeros, zeros, zeros, zeros, zeros], axis=0)        # (8, M)

    bytes_accessed = (idx_sub.size * 4 + idx_lane.size * 4
                      + packed["w_small"].size * 2
                      + packed["pred_wb"].size * 2
                      + num_graphs * PRED_PAD * 4)
    flops = (2 * N * NODE_TAB_ROWS * HIDDEN
             + LAYERS * (2 * E * EDGE_TAB_ROWS * HIDDEN
                         + 4 * E * N * HIDDEN
                         + 4 * N * HIDDEN * HIDDEN)
             + 2 * num_graphs * N * HIDDEN
             + 2 * num_graphs * HIDDEN * PRED_PAD)

    out = pl.pallas_call(
        functools.partial(net_fused_kernel, n_nodes=N, n_edges=E),
        out_shape=jax.ShapeDtypeStruct((num_graphs, PRED_PAD), jnp.float32),
        in_specs=[pl.BlockSpec(memory_space=pltpu.MemorySpace.VMEM)] * 4,
        out_specs=pl.BlockSpec(memory_space=pltpu.MemorySpace.VMEM),
        cost_estimate=pl.CostEstimate(flops=flops,
                                      transcendentals=num_graphs,
                                      bytes_accessed=bytes_accessed),
    )(idx_sub, idx_lane, packed["w_small"], packed["pred_wb"])

    # split the lane-dense slab into per-position predictions (glue)
    flat = out[:, :MAX_SEQ_LEN * NUM_VOCAB].reshape(
        num_graphs, MAX_SEQ_LEN, NUM_VOCAB)
    return [flat[:, i, :] for i in range(MAX_SEQ_LEN)]


# ---------------------------------------------------------------------------
# One-time parameter packing (done at init, NOT per forward call)
# ---------------------------------------------------------------------------
def pack_params(params):
    def pad_rows(a, rows):
        return jnp.pad(a, ((0, rows - a.shape[0]), (0, 0)))

    segs = [pad_rows(jnp.concatenate([params["type_emb"], params["attr_emb"],
                                      params["depth_emb"]], axis=0),
                     NODE_TAB_PAD)]
    for l in range(LAYERS):
        segs.append(pad_rows(
            jnp.concatenate([params["edge_type_emb"][l],
                             params["edge_attr_emb"][l]], axis=0),
            EDGE_TAB_PAD))
    for l in range(LAYERS):
        segs.append(pad_rows(
            jnp.concatenate([params["w1"][l], params["b1"][l]], axis=0), MLP_BLK))
        segs.append(pad_rows(
            jnp.concatenate([params["w2"][l], params["b2"][l]], axis=0), MLP_BLK))
    w_small = jnp.concatenate(segs, axis=0).astype(jnp.bfloat16)   # (W_ROWS, H)
    assert w_small.shape == (W_ROWS, HIDDEN)

    S, H, V = params["pred_w"].shape
    w_flat = jnp.transpose(params["pred_w"], (1, 0, 2)).reshape(H, S * V)
    b_flat = params["pred_b"].reshape(1, S * V)
    pred_wb = jnp.concatenate([w_flat, b_flat], axis=0)            # (H+1, S*V)
    pred_wb = jnp.pad(pred_wb,
                      ((0, 0), (0, PRED_PAD - S * V))).astype(jnp.bfloat16)
    return {"w_small": w_small, "pred_wb": pred_wb}


# ---------------------------------------------------------------------------
# Deterministic parameter / input construction
# ---------------------------------------------------------------------------
def make_params(key):
    ks = jax.random.split(key, 8 + 4 * LAYERS)
    i = 0

    def nrm(k, shape, scale=0.1):
        return (scale * jax.random.normal(k, shape)).astype(jnp.float32)

    params = {
        "type_emb": nrm(ks[i], (NUM_NODE_TYPES, HIDDEN)),
        "attr_emb": nrm(ks[i + 1], (NUM_NODE_ATTRS, HIDDEN)),
        "depth_emb": nrm(ks[i + 2], (MAX_DEPTH, HIDDEN)),
    }
    i += 3
    params["edge_type_emb"] = []
    params["edge_attr_emb"] = []
    params["w1"], params["b1"], params["w2"], params["b2"] = [], [], [], []
    for l in range(LAYERS):
        k0, k1, k2, k3 = jax.random.split(ks[i + l], 4)
        params["edge_type_emb"].append(nrm(k0, (NUM_EDGE_TYPES, HIDDEN)))
        params["edge_attr_emb"].append(nrm(k1, (NUM_EDGE_ATTRS, HIDDEN)))
        params["w1"].append(nrm(k2, (HIDDEN, HIDDEN)))
        params["b1"].append(jnp.zeros((1, HIDDEN), jnp.float32))
        params["w2"].append(nrm(k3, (HIDDEN, HIDDEN)))
        params["b2"].append(jnp.zeros((1, HIDDEN), jnp.float32))
    i += LAYERS
    params["pred_w"] = nrm(ks[i], (MAX_SEQ_LEN, HIDDEN, NUM_VOCAB))
    params["pred_b"] = jnp.zeros((MAX_SEQ_LEN, 1, NUM_VOCAB), jnp.float32)
    return params


if __name__ == "__main__":
    key = jax.random.PRNGKey(0)
    k_par, k_x0, k_x1, k_ei, k_ea0, k_ea1, k_dep = jax.random.split(key, 7)

    N, E, B = 16, 24, 2  # nodes, edges, graphs

    params = make_params(k_par)
    packed = pack_params(params)           # one-time weight packing

    x = jnp.stack(
        [jax.random.randint(k_x0, (N,), 0, NUM_NODE_TYPES),
         jax.random.randint(k_x1, (N,), 0, NUM_NODE_ATTRS)], axis=1).astype(jnp.int32)
    edge_index = jax.random.randint(k_ei, (2, E), 0, N).astype(jnp.int32)
    edge_attr = jnp.stack(
        [jax.random.randint(k_ea0, (E,), 0, NUM_EDGE_TYPES),
         jax.random.randint(k_ea1, (E,), 0, NUM_EDGE_ATTRS)], axis=1).astype(jnp.int32)
    node_depth = jax.random.randint(k_dep, (N, 1), 0, MAX_DEPTH).astype(jnp.int32)
    batch = jnp.concatenate(
        [jnp.zeros((N // 2,), jnp.int32), jnp.ones((N - N // 2,), jnp.int32)])

    pred_list = net_forward(packed, x, edge_index, edge_attr, node_depth,
                            batch, B)
    pred_list = [jax.block_until_ready(p) for p in pred_list]

    assert len(pred_list) == MAX_SEQ_LEN
    assert all(p.shape == (B, NUM_VOCAB) for p in pred_list)
    assert all(bool(jnp.all(jnp.isfinite(p))) for p in pred_list)
    print("KERNEL_OK")
</pallas_src>

<mosaic_0001>
module attributes {stable_mosaic.version = 11 : i64} {
  func.func @net_fused_kernel(%arg0: memref<24x8xi32, #tpu.memory_space<vmem>>, %arg1: memref<8x24xi32, #tpu.memory_space<vmem>>, %arg2: memref<256x32xbf16, #tpu.memory_space<vmem>>, %arg3: memref<33x128xbf16, #tpu.memory_space<vmem>>, %arg4: memref<2x128xf32, #tpu.memory_space<vmem>>) attributes {dimension_semantics = [], scalar_prefetch = 0 : i64, scratch_operands = 0 : i64, tpu.core_type = #tpu.core_type<tc>} {
    %c0 = arith.constant 0 : index
    %c0_0 = arith.constant 0 : index
    %0 = vector.load %arg0[%c0, %c0_0] : memref<24x8xi32, #tpu.memory_space<vmem>>, vector<16x1xi32>
    %c0_1 = arith.constant 0 : index
    %c1 = arith.constant 1 : index
    %1 = vector.load %arg0[%c0_1, %c1] : memref<24x8xi32, #tpu.memory_space<vmem>>, vector<16x1xi32>
    %c0_2 = arith.constant 0 : index
    %c2 = arith.constant 2 : index
    %2 = vector.load %arg0[%c0_2, %c2] : memref<24x8xi32, #tpu.memory_space<vmem>>, vector<16x1xi32>
    %3 = tpu.iota {dimensions = array<i32: 1>} : vector<16x22xi32>
    %4 = vector.broadcast %0 : vector<16x1xi32> to vector<16x22xi32>
    %5 = arith.cmpi eq, %3, %4 : vector<16x22xi32>
    %c5_i32 = arith.constant 5 : i32
    %6 = vector.broadcast %c5_i32 : i32 to vector<16x1xi32>
    %7 = arith.addi %1, %6 : vector<16x1xi32>
    %8 = vector.broadcast %7 : vector<16x1xi32> to vector<16x22xi32>
    %9 = arith.cmpi eq, %3, %8 : vector<16x22xi32>
    %10 = arith.ori %5, %9 : vector<16x22xi1>
    %c5_i32_3 = arith.constant 5 : i32
    %11 = vector.broadcast %c5_i32_3 : i32 to vector<16x1xi32>
    %12 = arith.addi %2, %11 : vector<16x1xi32>
    %c7_i32 = arith.constant 7 : i32
    %13 = vector.broadcast %c7_i32 : i32 to vector<16x1xi32>
    %14 = arith.addi %12, %13 : vector<16x1xi32>
    %15 = vector.broadcast %14 : vector<16x1xi32> to vector<16x22xi32>
    %16 = arith.cmpi eq, %3, %15 : vector<16x22xi32>
    %17 = arith.ori %10, %16 : vector<16x22xi1>
    %18 = arith.extui %17 : vector<16x22xi1> to vector<16x22xi32>
    %19 = arith.sitofp %18 : vector<16x22xi32> to vector<16x22xf32>
    %20 = arith.truncf %19 : vector<16x22xf32> to vector<16x22xbf16>
    %c0_4 = arith.constant 0 : index
    %c0_5 = arith.constant 0 : index
    %21 = vector.load %arg2[%c0_4, %c0_5] : memref<256x32xbf16, #tpu.memory_space<vmem>>, vector<22x32xbf16>
    %cst = arith.constant dense<0.000000e+00> : vector<16x32xf32>
    %22 = tpu.matmul %20, %21, %cst {dimension_numbers = #tpu.dot_dimension_numbers<[1], [0], [0], [1], [0, 0, 1, 1], [], []>} : vector<16x22xbf16>, vector<22x32xbf16>, vector<16x32xf32> -> vector<16x32xf32>
    %c0_6 = arith.constant 0 : index
    %c3 = arith.constant 3 : index
    %23 = vector.load %arg0[%c0_6, %c3] : memref<24x8xi32, #tpu.memory_space<vmem>>, vector<24x1xi32>
    %24 = tpu.iota {dimensions = array<i32: 1>} : vector<24x16xi32>
    %25 = vector.broadcast %23 : vector<24x1xi32> to vector<24x16xi32>
    %26 = arith.cmpi eq, %24, %25 : vector<24x16xi32>
    %27 = arith.extui %26 : vector<24x16xi1> to vector<24x16xi32>
    %28 = arith.sitofp %27 : vector<24x16xi32> to vector<24x16xf32>
    %29 = arith.truncf %28 : vector<24x16xf32> to vector<24x16xbf16>
    %c0_7 = arith.constant 0 : index
    %c0_8 = arith.constant 0 : index
    %30 = vector.load %arg1[%c0_7, %c0_8] : memref<8x24xi32, #tpu.memory_space<vmem>>, vector<1x24xi32>
    %31 = tpu.iota {dimensions = array<i32: 0>} : vector<16x24xi32>
    %32 = vector.broadcast %30 : vector<1x24xi32> to vector<16x24xi32>
    %33 = arith.cmpi eq, %31, %32 : vector<16x24xi32>
    %34 = arith.extui %33 : vector<16x24xi1> to vector<16x24xi32>
    %35 = arith.sitofp %34 : vector<16x24xi32> to vector<16x24xf32>
    %36 = arith.truncf %35 : vector<16x24xf32> to vector<16x24xbf16>
    %c0_9 = arith.constant 0 : index
    %c4 = arith.constant 4 : index
    %37 = vector.load %arg0[%c0_9, %c4] : memref<24x8xi32, #tpu.memory_space<vmem>>, vector<24x1xi32>
    %c0_10 = arith.constant 0 : index
    %c5 = arith.constant 5 : index
    %38 = vector.load %arg0[%c0_10, %c5] : memref<24x8xi32, #tpu.memory_space<vmem>>, vector<24x1xi32>
    %39 = tpu.iota {dimensions = array<i32: 1>} : vector<24x5xi32>
    %40 = vector.broadcast %37 : vector<24x1xi32> to vector<24x5xi32>
    %41 = arith.cmpi eq, %39, %40 : vector<24x5xi32>
    %c3_i32 = arith.constant 3 : i32
    %42 = vector.broadcast %c3_i32 : i32 to vector<24x1xi32>
    %43 = arith.addi %38, %42 : vector<24x1xi32>
    %44 = vector.broadcast %43 : vector<24x1xi32> to vector<24x5xi32>
    %45 = arith.cmpi eq, %39, %44 : vector<24x5xi32>
    %46 = arith.ori %41, %45 : vector<24x5xi1>
    %47 = arith.extui %46 : vector<24x5xi1> to vector<24x5xi32>
    %48 = arith.sitofp %47 : vector<24x5xi32> to vector<24x5xf32>
    %49 = arith.truncf %48 : vector<24x5xf32> to vector<24x5xbf16>
    %c32 = arith.constant 32 : index
    %c0_11 = arith.constant 0 : index
    %50 = vector.load %arg2[%c32, %c0_11] : memref<256x32xbf16, #tpu.memory_space<vmem>>, vector<5x32xbf16>
    %cst_12 = arith.constant dense<0.000000e+00> : vector<24x32xf32>
    %51 = tpu.matmul %49, %50, %cst_12 {dimension_numbers = #tpu.dot_dimension_numbers<[1], [0], [0], [1], [0, 0, 1, 1], [], []>} : vector<24x5xbf16>, vector<5x32xbf16>, vector<24x32xf32> -> vector<24x32xf32>
    %52 = arith.truncf %22 : vector<16x32xf32> to vector<16x32xbf16>
    %cst_13 = arith.constant dense<0.000000e+00> : vector<24x32xf32>
    %53 = tpu.matmul %29, %52, %cst_13 {dimension_numbers = #tpu.dot_dimension_numbers<[1], [0], [0], [1], [0, 0, 1, 1], [], []>} : vector<24x16xbf16>, vector<16x32xbf16>, vector<24x32xf32> -> vector<24x32xf32>
    %54 = arith.addf %53, %51 : vector<24x32xf32>
    %cst_14 = arith.constant 0.000000e+00 : f32
    %55 = vector.broadcast %cst_14 : f32 to vector<24x32xf32>
    %56 = arith.maximumf %54, %55 : vector<24x32xf32>
    %57 = arith.truncf %56 : vector<24x32xf32> to vector<24x32xbf16>
    %cst_15 = arith.constant dense<0.000000e+00> : vector<16x32xf32>
    %58 = tpu.matmul %36, %57, %cst_15 {dimension_numbers = #tpu.dot_dimension_numbers<[1], [0], [0], [1], [0, 0, 1, 1], [], []>} : vector<16x24xbf16>, vector<24x32xbf16>, vector<16x32xf32> -> vector<16x32xf32>
    %cst_16 = arith.constant 1.000000e+00 : f32
    %59 = vector.broadcast %cst_16 : f32 to vector<16x32xf32>
    %60 = arith.mulf %59, %22 : vector<16x32xf32>
    %61 = arith.addf %60, %58 : vector<16x32xf32>
    %62 = arith.truncf %61 : vector<16x32xf32> to vector<16x32xbf16>
    %c64 = arith.constant 64 : index
    %c0_17 = arith.constant 0 : index
    %63 = vector.load %arg2[%c64, %c0_17] : memref<256x32xbf16, #tpu.memory_space<vmem>>, vector<32x32xbf16>
    %cst_18 = arith.constant dense<0.000000e+00> : vector<16x32xf32>
    %64 = tpu.matmul %62, %63, %cst_18 {dimension_numbers = #tpu.dot_dimension_numbers<[1], [0], [0], [1], [0, 0, 1, 1], [], []>} : vector<16x32xbf16>, vector<32x32xbf16>, vector<16x32xf32> -> vector<16x32xf32>
    %c96 = arith.constant 96 : index
    %c0_19 = arith.constant 0 : index
    %65 = vector.load %arg2[%c96, %c0_19] : memref<256x32xbf16, #tpu.memory_space<vmem>>, vector<1x32xbf16>
    %66 = arith.extf %65 : vector<1x32xbf16> to vector<1x32xf32>
    %67 = vector.broadcast %66 : vector<1x32xf32> to vector<16x32xf32>
    %68 = arith.addf %64, %67 : vector<16x32xf32>
    %cst_20 = arith.constant 0.000000e+00 : f32
    %69 = vector.broadcast %cst_20 : f32 to vector<16x32xf32>
    %70 = arith.maximumf %68, %69 : vector<16x32xf32>
    %71 = arith.truncf %70 : vector<16x32xf32> to vector<16x32xbf16>
    %c112 = arith.constant 112 : index
    %c0_21 = arith.constant 0 : index
    %72 = vector.load %arg2[%c112, %c0_21] : memref<256x32xbf16, #tpu.memory_space<vmem>>, vector<32x32xbf16>
    %cst_22 = arith.constant dense<0.000000e+00> : vector<16x32xf32>
    %73 = tpu.matmul %71, %72, %cst_22 {dimension_numbers = #tpu.dot_dimension_numbers<[1], [0], [0], [1], [0, 0, 1, 1], [], []>} : vector<16x32xbf16>, vector<32x32xbf16>, vector<16x32xf32> -> vector<16x32xf32>
    %c144 = arith.constant 144 : index
    %c0_23 = arith.constant 0 : index
    %74 = vector.load %arg2[%c144, %c0_23] : memref<256x32xbf16, #tpu.memory_space<vmem>>, vector<1x32xbf16>
    %75 = arith.extf %74 : vector<1x32xbf16> to vector<1x32xf32>
    %76 = vector.broadcast %75 : vector<1x32xf32> to vector<16x32xf32>
    %77 = arith.addf %73, %76 : vector<16x32xf32>
    %c48 = arith.constant 48 : index
    %c0_24 = arith.constant 0 : index
    %78 = vector.load %arg2[%c48, %c0_24] : memref<256x32xbf16, #tpu.memory_space<vmem>>, vector<5x32xbf16>
    %cst_25 = arith.constant dense<0.000000e+00> : vector<24x32xf32>
    %79 = tpu.matmul %49, %78, %cst_25 {dimension_numbers = #tpu.dot_dimension_numbers<[1], [0], [0], [1], [0, 0, 1, 1], [], []>} : vector<24x5xbf16>, vector<5x32xbf16>, vector<24x32xf32> -> vector<24x32xf32>
    %80 = arith.truncf %77 : vector<16x32xf32> to vector<16x32xbf16>
    %cst_26 = arith.constant dense<0.000000e+00> : vector<24x32xf32>
    %81 = tpu.matmul %29, %80, %cst_26 {dimension_numbers = #tpu.dot_dimension_numbers<[1], [0], [0], [1], [0, 0, 1, 1], [], []>} : vector<24x16xbf16>, vector<16x32xbf16>, vector<24x32xf32> -> vector<24x32xf32>
    %82 = arith.addf %81, %79 : vector<24x32xf32>
    %cst_27 = arith.constant 0.000000e+00 : f32
    %83 = vector.broadcast %cst_27 : f32 to vector<24x32xf32>
    %84 = arith.maximumf %82, %83 : vector<24x32xf32>
    %85 = arith.truncf %84 : vector<24x32xf32> to vector<24x32xbf16>
    %cst_28 = arith.constant dense<0.000000e+00> : vector<16x32xf32>
    %86 = tpu.matmul %36, %85, %cst_28 {dimension_numbers = #tpu.dot_dimension_numbers<[1], [0], [0], [1], [0, 0, 1, 1], [], []>} : vector<16x24xbf16>, vector<24x32xbf16>, vector<16x32xf32> -> vector<16x32xf32>
    %cst_29 = arith.constant 1.000000e+00 : f32
    %87 = vector.broadcast %cst_29 : f32 to vector<16x32xf32>
    %88 = arith.mulf %87, %77 : vector<16x32xf32>
    %89 = arith.addf %88, %86 : vector<16x32xf32>
    %90 = arith.truncf %89 : vector<16x32xf32> to vector<16x32xbf16>
    %c160 = arith.constant 160 : index
    %c0_30 = arith.constant 0 : index
    %91 = vector.load %arg2[%c160, %c0_30] : memref<256x32xbf16, #tpu.memory_space<vmem>>, vector<32x32xbf16>
    %cst_31 = arith.constant dense<0.000000e+00> : vector<16x32xf32>
    %92 = tpu.matmul %90, %91, %cst_31 {dimension_numbers = #tpu.dot_dimension_numbers<[1], [0], [0], [1], [0, 0, 1, 1], [], []>} : vector<16x32xbf16>, vector<32x32xbf16>, vector<16x32xf32> -> vector<16x32xf32>
    %c192 = arith.constant 192 : index
    %c0_32 = arith.constant 0 : index
    %93 = vector.load %arg2[%c192, %c0_32] : memref<256x32xbf16, #tpu.memory_space<vmem>>, vector<1x32xbf16>
    %94 = arith.extf %93 : vector<1x32xbf16> to vector<1x32xf32>
    %95 = vector.broadcast %94 : vector<1x32xf32> to vector<16x32xf32>
    %96 = arith.addf %92, %95 : vector<16x32xf32>
    %cst_33 = arith.constant 0.000000e+00 : f32
    %97 = vector.broadcast %cst_33 : f32 to vector<16x32xf32>
    %98 = arith.maximumf %96, %97 : vector<16x32xf32>
    %99 = arith.truncf %98 : vector<16x32xf32> to vector<16x32xbf16>
    %c208 = arith.constant 208 : index
    %c0_34 = arith.constant 0 : index
    %100 = vector.load %arg2[%c208, %c0_34] : memref<256x32xbf16, #tpu.memory_space<vmem>>, vector<32x32xbf16>
    %cst_35 = arith.constant dense<0.000000e+00> : vector<16x32xf32>
    %101 = tpu.matmul %99, %100, %cst_35 {dimension_numbers = #tpu.dot_dimension_numbers<[1], [0], [0], [1], [0, 0, 1, 1], [], []>} : vector<16x32xbf16>, vector<32x32xbf16>, vector<16x32xf32> -> vector<16x32xf32>
    %c240 = arith.constant 240 : index
    %c0_36 = arith.constant 0 : index
    %102 = vector.load %arg2[%c240, %c0_36] : memref<256x32xbf16, #tpu.memory_space<vmem>>, vector<1x32xbf16>
    %103 = arith.extf %102 : vector<1x32xbf16> to vector<1x32xf32>
    %104 = vector.broadcast %103 : vector<1x32xf32> to vector<16x32xf32>
    %105 = arith.addf %101, %104 : vector<16x32xf32>
    %c1_37 = arith.constant 1 : index
    %c0_38 = arith.constant 0 : index
    %106 = vector.load %arg1[%c1_37, %c0_38] : memref<8x24xi32, #tpu.memory_space<vmem>>, vector<1x16xi32>
    %107 = tpu.iota {dimensions = array<i32: 0>} : vector<2x16xi32>
    %108 = vector.broadcast %106 : vector<1x16xi32> to vector<2x16xi32>
    %109 = arith.cmpi eq, %107, %108 : vector<2x16xi32>
    %110 = arith.extui %109 : vector<2x16xi1> to vector<2x16xi32>
    %111 = arith.sitofp %110 : vector<2x16xi32> to vector<2x16xf32>
    %cst_39 = arith.constant dense<0.000000e+00> : vector<2xf32>
    %112 = vector.multi_reduction <add>, %111, %cst_39 [1] : vector<2x16xf32> to vector<2xf32>
    %113 = vector.shape_cast %112 : vector<2xf32> to vector<2x1xf32>
    %cst_40 = arith.constant 1.000000e+00 : f32
    %114 = vector.broadcast %cst_40 : f32 to vector<2x1xf32>
    %115 = arith.maximumf %113, %114 : vector<2x1xf32>
    %116 = tpu.reciprocal %115 {approx = true} : vector<2x1xf32> -> vector<2x1xf32>
    %117 = arith.truncf %111 : vector<2x16xf32> to vector<2x16xbf16>
    %118 = arith.truncf %105 : vector<16x32xf32> to vector<16x32xbf16>
    %cst_41 = arith.constant dense<0.000000e+00> : vector<2x32xf32>
    %119 = tpu.matmul %117, %118, %cst_41 {dimension_numbers = #tpu.dot_dimension_numbers<[1], [0], [0], [1], [0, 0, 1, 1], [], []>} : vector<2x16xbf16>, vector<16x32xbf16>, vector<2x32xf32> -> vector<2x32xf32>
    %120 = vector.broadcast %116 : vector<2x1xf32> to vector<2x32xf32>
    %121 = arith.mulf %119, %120 : vector<2x32xf32>
    %122 = arith.truncf %121 : vector<2x32xf32> to vector<2x32xbf16>
    %c0_42 = arith.constant 0 : index
    %c0_43 = arith.constant 0 : index
    %123 = vector.load %arg3[%c0_42, %c0_43] : memref<33x128xbf16, #tpu.memory_space<vmem>>, vector<32x128xbf16>
    %cst_44 = arith.constant dense<0.000000e+00> : vector<2x128xf32>
    %124 = tpu.matmul %122, %123, %cst_44 {dimension_numbers = #tpu.dot_dimension_numbers<[1], [0], [0], [1], [0, 0, 1, 1], [], []>} : vector<2x32xbf16>, vector<32x128xbf16>, vector<2x128xf32> -> vector<2x128xf32>
    %c32_45 = arith.constant 32 : index
    %c0_46 = arith.constant 0 : index
    %125 = vector.load %arg3[%c32_45, %c0_46] : memref<33x128xbf16, #tpu.memory_space<vmem>>, vector<1x128xbf16>
    %126 = arith.extf %125 : vector<1x128xbf16> to vector<1x128xf32>
    %127 = vector.broadcast %126 : vector<1x128xf32> to vector<2x128xf32>
    %128 = arith.addf %124, %127 : vector<2x128xf32>
    %c0_47 = arith.constant 0 : index
    %c0_48 = arith.constant 0 : index
    %129 = vector.load %arg4[%c0_47, %c0_48] : memref<2x128xf32, #tpu.memory_space<vmem>>, vector<2x128xf32>
    tpu.vector_store %arg4[%c0_47, %c0_48], %128 {strides = array<i32>} : memref<2x128xf32, #tpu.memory_space<vmem>>, vector<2x128xf32>,
    return
  }
}

</mosaic_0001>

<bundles_post_ra>
// kernel: net_forward.1
= control target key start
LH: loop header
LB: loop body
LE: loop exit
PB: predicated region body
PF: predicated region fallthrough
CT: control target
= control target key end

     0   :  { %v649_v0 = vmov 0   ;;  %v650_v2 = vmov 1   ;;  %v651_v4 = vmov 2   ;;  %v652_v9 = vmov 3   ;;  %s829_s0 = inlined_call_operand.vmem [shape: s32[24,8], index: 0, kind: input, shape index: {}]   ;;  %s830_s2 = inlined_call_operand.vmem [shape: bf16[256,32], index: 2, kind: input, shape index: {}]   ;;  %s831_s1 = inlined_call_operand.vmem [shape: s32[8,24], index: 1, kind: input, shape index: {}]   ;;  %s832_s3 = inlined_call_operand.vmem [shape: bf16[33,128], index: 3, kind: input, shape index: {}]   ;;  %s833_s4 = inlined_call_operand.vmem [shape: f32[2,128], index: 4, kind: output, shape index: {}]  }
   0x1   :  { %633 = vset.pattern.permute.xlu0 %v649_v0  ;;  %v18_v1 = vld [vmem:[%s829_s0] sm:$0xff]  ;;  %634 = vset.pattern.permute.xlu1 %v650_v2  ;;  %v19_v6 = vld [vmem:[%s829_s0 + $0x8] sm:$0xff]  ;;  %v653_v10 = vmov 4   ;;  %v654_v12 = vmov 5   ;;  %v95_v13 = vld [vmem:[%s829_s0 + $0x10] sm:$0xff]  ;;  %vm75_vm0 = vcmask 1042432   ;;  %v20_v21 = vlaneseq }
   0x2   :  { %23 = vperm.xlu0 %633, %v18_v1   ;;  %v30_v3 = vadd.s32 5, %v18_v1  ;;  %635 = vset.pattern.permute.xlu2 %v651_v4  ;;  %v31_v7 = vadd.s32 5, %v19_v6  ;;  %v141_v11 = vadd.s32 3, %v19_v6  ;;  %v61_v14 = vld [vmem:[%s830_s2 + $0x8] sm:$0x7]  ;;  %v142_v16 = vadd.s32 3, %v95_v13 }
   0x3   :  { %v67_v15 = vunpack.c.l.b16 %v61_v14  ;;  %v614_v19 = vld [vmem:[%s830_s2] sm:$0xff]  ;;  %v140_v20 = vadd.s32 3, %v18_v1  ;;  %v699_v24 = vand.u32 127, %v20_v21  ;;  %v655_v29 = vmov 0.0   ;;  %v166_v38 = vld [vmem:[%s830_s2 + $0x10] sm:$0x7] }
   0x4   :  { %33 = vperm.xlu1 %634, %v30_v3   ;;  %v42_v5 = vadd.s32 7, %v30_v3  ;;  %v43_v8 = vadd.s32 7, %v31_v7  ;;  %vm71_vm11 = vcmask 179200   ;;  %vm174_vm14 = vcmask 1041408   ;;  %v330_v55 = vld [vmem:[%s830_s2 + $0x18] sm:$0x7] }
   0x5   :  { %v69_v17 = vpack.c.b16 %v67_v15, %v67_v15  ;;  %v656_v39 = vmov 65535  }
   0x6   :  { %45 = vperm.xlu2 %635, %v42_v5   ;;  %v175_v40 = vsel %vm174_vm14, 4294967295, %v656_v39  ;;  %vm229_vm14 = vcmask 195584  }
   0x7   :  { %v77_v18 = vsel %vm75_vm0, %v69_v17, 0  ;;  %v176_v41 = vsel %vm75_vm0, %v175_v40, 0  ;;  %vm167_vm0 = vcmask 39936  }
   0x8   :  { %85 = vmatpush.bf16.msra.mxu0 %v77_v18  ;;  %v178_v42 = vand.u32 %v176_v41, %v166_v38  ;;  %v332_v56 = vand.u32 %v330_v55, %v176_v41 }
   0xa   :  { %26 = vperm.xlu0 %633, %v19_v6   ;;  %187 = vmatpush.bf16.msra.mxu1 %v178_v42 }
   0xc   :  { %36 = vperm.xlu1 %634, %v31_v7   ;;  %86 = vmatpush.bf16.msra.mxu0 %v614_v19 }
   0xe   :  { %48 = vperm.xlu2 %635, %v43_v8   ;;  %341 = vmatpush.bf16.msrb.mxu1 %v332_v56  ;;  %v750_v8 = vshrl.u32 %v20_v21, 7 }
  0x12   :  { %636 = vset.pattern.permute.xlu0 %v652_v9 }
  0x13   :  { %97 = vperm.xlu0 %636, %v18_v1  }
  0x14   :  { %637 = vset.pattern.permute.xlu1 %v652_v9 }
  0x15   :  { %100 = vperm.xlu1 %637, %v19_v6  }
  0x16   :  { %638 = vset.pattern.permute.xlu2 %v653_v10 }
  0x17   :  { %129 = vperm.xlu2 %638, %v18_v1  }
  0x1b   :  { %641 = vset.pattern.permute.xlu0 %v654_v12 }
  0x1c   :  { %147 = vperm.xlu0 %641, %v141_v11   ;;  %v119_v11 = vadd.s32 8, %v750_v8 }
  0x1d   :  { %639 = vset.pattern.permute.xlu1 %v653_v10 }
  0x1e   :  { %132 = vperm.xlu1 %639, %v19_v6  }
  0x1f   :  { %640 = vset.pattern.permute.xlu2 %v654_v12 }
  0x20   :  { %144 = vperm.xlu2 %640, %v140_v20  }
  0x26   :  { %642 = vset.pattern.permute.xlu1 %v652_v9 }
  0x27   :  { %103 = vperm.xlu1 %642, %v95_v13  }
  0x28   :  { %643 = vset.pattern.permute.xlu2 %v653_v10 }
  0x29   :  { %135 = vperm.xlu2 %643, %v95_v13  }
  0x2f   :  { %644 = vset.pattern.permute.xlu1 %v654_v12  ;;  %v645_v12 = vld [vmem:[%s831_s1] ss:$0 sm:$0xff] }
  0x30   :  { %150 = vperm.xlu1 %644, %v142_v16  }
  0x60   :  { %v46_v22 = vpop.permute.xlu2 %45 }
  0x61   :  { %vm50_vm3 = vcmp.eq.s32.totalorder %v699_v24, %v46_v22 }
  0x68   :  { %v49_v27 = vpop.permute.xlu2 %48 }
  0x69   :  { %vm51_vm8 = vcmp.eq.s32.totalorder %v699_v24, %v49_v27 }
  0x71   :  { %v130_v43 = vpop.permute.xlu2 %129 }
  0x74   :  { %v24_v23 = vpop.permute.xlu0 %23 }
  0x75   :  { %vm28_vm1 = vcmp.eq.s32.totalorder %v699_v24, %v24_v23 }
  0x76   :  { %v34_v25 = vpop.permute.xlu1 %33 }
  0x77   :  { %vm38_vm2 = vcmp.eq.s32.totalorder %v699_v24, %v34_v25  ;;  %v616_v25 = vld [vmem:[%s830_s2 + $0x28] sm:$0xff] }
  0x78   :  { %vm40_vm4 = vmor %vm28_vm1, %vm38_vm2  ;;  %283 = vmatpush.bf16.msrb.mxu0 %v616_v25 }
  0x79   :  { %vm52_vm5 = vmor %vm40_vm4, %vm50_vm3  ;;  %vm137_vm3 = vcmp.eq.s32.totalorder %v699_v24, %v130_v43 }
  0x7a   :  { %v542_v30 = vsel %vm52_vm5, 1.0, %v655_v29  ;;  %v145_v46 = vpop.permute.xlu2 %144 }
  0x7b   :  { %vm152_vm4 = vcmp.eq.s32.totalorder %v699_v24, %v145_v46  ;;  %v298_v46 = vld [vmem:[%s830_s2 + $0x48] sm:$0x1] }
  0x7c   :  { %v27_v26 = vpop.permute.xlu0 %26  ;;  %vm155_vm5 = vmor %vm137_vm3, %vm152_vm4 }
  0x7d   :  { %vm29_vm6 = vcmp.eq.s32.totalorder %v699_v24, %v27_v26  ;;  %v554_v48 = vsel %vm155_vm5, 1.0, %v655_v29  ;;  %v615_v26 = vld [vmem:[%s830_s2 + $0x20] sm:$0xff] }
  0x7e   :  { %v37_v28 = vpop.permute.xlu1 %36  ;;  %284 = vmatpush.bf16.msrb.mxu0 %v615_v26  ;;  %v439_v26 = vld [vmem:[%s830_s2 + $0x78] sm:$0x1] }
  0x7f   :  { %vm39_vm7 = vcmp.eq.s32.totalorder %v699_v24, %v37_v28 }
  0x80   :  { %vm41_vm9 = vmor %vm29_vm6, %vm39_vm7 }
  0x81   :  { %vm53_vm10 = vmor %vm41_vm9, %vm51_vm8  ;;  %vm199_vm9 = vcmask 130048  }
  0x82   :  { %v543_v31 = vsel %vm53_vm10, 1.0, %v655_v29 }
  0x83   :  { %v58_v32 = vpack.c.bf16 %v543_v31, %v542_v30  ;;  %v136_v51 = vpop.permute.xlu2 %135 }
  0x84   :  { %vm139_vm6 = vcmp.eq.s32.totalorder %v699_v24, %v136_v51 }
  0x85   :  { %548 = vmatmul.msk.bf16.vlgmr.msra.gmra.mxu0 %vm71_vm11, %v58_v32  ;;  %v98_v33 = vpop.permute.xlu0 %97  ;;  %vm233_vm11 = vcmask 1043456  }
  0x86   :  { %vm105_vm12 = vcmp.eq.s32.totalorder %v699_v24, %v98_v33  ;;  %v618_v33 = vld [vmem:[%s830_s2 + $0x40] sm:$0xff] }
  0x87   :  { %v549_v34 = vsel %vm105_vm12, 1.0, %v655_v29  ;;  %v101_v35 = vpop.permute.xlu1 %100  ;;  %vm121_vm12 = vcmp.eq.s32.totalorder %v750_v8, %v645_v12 }
  0x88   :  { %vm106_vm13 = vcmp.eq.s32.totalorder %v699_v24, %v101_v35  ;;  %v552_v21 = vsel %vm121_vm12, 1.0, %v655_v29  ;;  %v258_v35 = vld [vmem:[%s830_s2 + $0x30] sm:$0x1] }
  0x89   :  { %v550_v36 = vsel %vm106_vm13, 1.0, %v655_v29  ;;  %vm122_vm13 = vcmp.eq.s32.totalorder %v119_v11, %v645_v12  ;;  %v621_v11 = vld [vmem:[%s830_s2 + $0x68] sm:$0xff]  ;;  %v400_v12 = vld [vmem:[%s830_s2 + $0x60] sm:$0x1] }
  0x8a   :  { %v713_v37 = vpack.c.bf16 %v550_v36, %v549_v34  ;;  %v553_v22 = vsel %vm122_vm13, 1.0, %v655_v29  ;;  %v617_v34 = vld [vmem:[%s830_s2 + $0x38] sm:$0xff]  ;;  %v259_v36 = vunpack.c.l.bf16 %v258_v35 }
  0x8c   :  { %v260_v39 = vperm.slane %v259_v36, 0 }
  0x8e   :  { %v148_v44 = vpop.permute.xlu0 %147 }
  0x8f   :  { %vm153_vm15 = vcmp.eq.s32.totalorder %v699_v24, %v148_v44 }
  0x90   :  { %v133_v45 = vpop.permute.xlu1 %132 }
  0x91   :  { %vm138_vm1 = vcmp.eq.s32.totalorder %v699_v24, %v133_v45 }
  0x92   :  { %vm156_vm2 = vmor %vm138_vm1, %vm153_vm15  ;;  %vm273_vm15 = vcmask 261120  }
  0x93   :  { %v555_v47 = vsel %vm156_vm2, 1.0, %v655_v29  ;;  %vm476_vm2 = vcmask 123904  }
  0x94   :  { %v164_v49 = vpack.c.bf16 %v555_v47, %v554_v48  ;;  %v299_v48 = vunpack.c.l.bf16 %v298_v46 }
  0x96   :  { %557 = vmatmul.msk.bf16.vlgmr.msra.gmra.mxu1 %vm167_vm0, %v164_v49 }
  0x99   :  { %v104_v50 = vpop.permute.xlu1 %103 }
  0x9a   :  { %vm107_vm10 = vcmp.eq.s32.totalorder %v699_v24, %v104_v50 }
  0x9b   :  { %v551_v60 = vsel %vm107_vm10, 1.0, %v655_v29 }
  0x9c   :  { %v739_v61 = vpack.c.bf16 %v551_v60, %v551_v60 }
  0xa2   :  { %v151_v52 = vpop.permute.xlu1 %150 }
  0xa3   :  { %vm154_vm7 = vcmp.eq.s32.totalorder %v699_v24, %v151_v52  ;;  %v127_v24 = vpack.c.bf16 %v553_v22, %v552_v21  ;;  %v646_v22 = vld [vmem:[%s831_s1 + $0x1] ss:$0 sm:$0xff] }
  0xa4   :  { %vm157_vm8 = vmor %vm139_vm6, %vm154_vm7  ;;  %vm473_vm1 = vcmp.eq.s32.totalorder %v750_v8, %v646_v22 }
  0xa5   :  { %v556_v53 = vsel %vm157_vm8, 1.0, %v655_v29 }
  0xa6   :  { %v165_v54 = vpack.c.bf16 %v556_v53, %v556_v53 }
  0xa8   :  { %558 = vmatmul.msk.bf16.gmra.mxu1 %vm167_vm0, %v165_v54 }
  0xb8   :  { %580 = vmatmul.msk.bf16.vlgmr.msrb.gmra.mxu1 %vm167_vm0, %v164_v49  ;;  %v300_v49 = vperm.slane %v299_v48, 0 }
  0xc8   :  { %581 = vmatmul.msk.bf16.gmra.mxu1 %vm167_vm0, %v165_v54 }
 0x102   :  { %v88_v57 = vpop.f32.mrf.mxu0 }
 0x10a   :  { %v90_v58 = vpop.f32.mrf.mxu0 }
 0x10b   :  { %v198_v59 = vpack.c.bf16 %v90_v58, %v88_v57 }
 0x10d   :  { %213 = vmatpush.bf16.msra.mxu2 %v198_v59 }
 0x110   :  { %559 = vmatmul.msk.bf16.vlgmr.msra.gmra.mxu2 %vm199_vm9, %v713_v37 }
 0x113   :  { %v189_v62 = vpop.f32.mrf.mxu1 }
 0x11b   :  { %v191_v63 = vpop.f32.mrf.mxu1 }
 0x120   :  { %560 = vmatmul.msk.bf16.gmra.mxu2 %vm199_vm9, %v739_v61 }
 0x125   :  { %v194_v0 = vpop.f32.mrf.mxu1 }
 0x12d   :  { %v196_v1 = vpop.f32.mrf.mxu1 }
 0x135   :  { %v743_v2 = vpop.f32.mrf.mxu1 }
 0x13d   :  { %v745_v3 = vpop.f32.mrf.mxu1 }
 0x145   :  { %v747_v4 = vpop.f32.mrf.mxu1 }
 0x14d   :  { %v350_v5 = vpop.f32.mrf.mxu1 }
 0x193   :  { %v215_v6 = vpop.f32.mrf.mxu2 }
 0x194   :  { %v216_v15 = vadd.f32 %v215_v6, %v189_v62 }
 0x196   :  { %v224_v19 = vmax.f32 %v216_v15, 0.0 }
 0x19b   :  { %v217_v7 = vpop.f32.mrf.mxu2 }
 0x19c   :  { %v218_v13 = vadd.f32 %v217_v7, %v191_v63 }
 0x19e   :  { %v225_v17 = vmax.f32 %v218_v13, 0.0  ;;  %v401_v13 = vunpack.c.l.bf16 %v400_v12 }
 0x1a0   :  { %v227_v23 = vpack.c.bf16 %v225_v17, %v224_v19  ;;  %v402_v15 = vperm.slane %v401_v13, 0 }
 0x1a3   :  { %v220_v9 = vpop.f32.mrf.mxu2 }
 0x1a4   :  { %v221_v10 = vadd.f32 %v220_v9, %v194_v0 }
 0x1a6   :  { %v226_v14 = vmax.f32 %v221_v10, 0.0  ;;  %v622_v10 = vld [vmem:[%s830_s2 + $0x70] sm:$0xff] }
 0x1a8   :  { %v228_v16 = vpack.c.bf16 %v226_v14, %v226_v14 }
 0x1aa   :  { %v235_v18 = vsel %vm233_vm11, %v228_v16, 0 }
 0x1ab   :  { %v222_v20 = vpop.f32.mrf.mxu2  ;;  %243 = vmatpush.bf16.msra.mxu3 %v235_v18 }
 0x1af   :  { %244 = vmatpush.bf16.msra.mxu3 %v227_v23  ;;  %v603_v23 = vsel %vm473_vm1, 1.0, %v655_v29 }
 0x1b0   :  { %v477_v25 = vsel %vm476_vm2, %v603_v23, 0.0  ;;  %v482_v29 = vpack.c.bf16 %v603_v23, %v603_v23 }
 0x1b1   :  { %478 = vadd.xlane.f32.xlu2 %v477_v25 }
 0x1b2   :  { %561 = vmatmul.msk.bf16.vlgmr.msra.gmra.mxu3 %vm229_vm14, %v127_v24 }
 0x1b3   :  { %322 = vmatpush.bf16.msrb.mxu3 %v618_v33 }
 0x1b7   :  { %323 = vmatpush.bf16.msrb.mxu3 %v617_v34  ;;  %v623_v34 = vld [vmem:[%s832_s3] sm:$0xff] }
 0x224   :  { %v479_v35 = vpop.xlane.xlu2 %478 }
 0x225   :  { %v480_v36 = vmax.f32 %v479_v35, 1.0 }
 0x227   :  { %647 = vrcp.f32 %v480_v36 }
 0x235   :  { %v246_v27 = vpop.f32.mrf.mxu3 }
 0x236   :  { %v251_v30 = vadd.f32 %v246_v27, %v88_v57 }
 0x23d   :  { %v248_v28 = vpop.f32.mrf.mxu3 }
 0x23e   :  { %v252_v31 = vadd.f32 %v248_v28, %v90_v58  ;;  %v440_v28 = vunpack.c.l.bf16 %v439_v26 }
 0x240   :  { %v253_v32 = vpack.c.bf16 %v252_v31, %v251_v30  ;;  %v441_v30 = vperm.slane %v440_v28, 0 }
 0x242   :  { %570 = vmatmul.msk.bf16.vlgmr.msrb.gmra.mxu0 %vm273_vm15, %v253_v32 }
 0x2bf   :  { %v286_v38 = vpop.f32.mrf.mxu0 }
 0x2c0   :  { %v287_v40 = vadd.f32 %v286_v38, %v260_v39  ;;  %v648_v38 = vpop.eup %647 }
 0x2c2   :  { %v291_v43 = vmax.f32 %v287_v40, 0.0 }
 0x2c7   :  { %v288_v41 = vpop.f32.mrf.mxu0 }
 0x2c8   :  { %v289_v42 = vadd.f32 %v288_v41, %v260_v39 }
 0x2ca   :  { %v292_v44 = vmax.f32 %v289_v42, 0.0 }
 0x2cc   :  { %v293_v45 = vpack.c.bf16 %v292_v44, %v291_v43  ;;  %v506_v43 = vld [vmem:[%s832_s3 + $0x10] sm:$0x1] }
 0x2cd   :  { %v507_v44 = vunpack.c.l.bf16 %v506_v43 }
 0x2ce   :  { %579 = vmatmul.msk.bf16.vlgmr.msrb.gmra.mxu3 %vm273_vm15, %v293_v45 }
 0x2cf   :  { %v508_v45 = vperm.slane %v507_v44, 0 }
 0x351   :  { %v325_v47 = vpop.f32.mrf.mxu3 }
 0x352   :  { %v326_v51 = vadd.f32 %v325_v47, %v300_v49 }
 0x359   :  { %v327_v50 = vpop.f32.mrf.mxu3 }
 0x35a   :  { %v328_v52 = vadd.f32 %v327_v50, %v300_v49 }
 0x35c   :  { %v352_v53 = vpack.c.bf16 %v328_v52, %v326_v51 }
 0x35e   :  { %360 = vmatpush.bf16.msrb.mxu2 %v352_v53 }
 0x361   :  { %582 = vmatmul.msk.bf16.vlgmr.msrb.gmra.mxu2 %vm199_vm9, %v713_v37 }
 0x371   :  { %583 = vmatmul.msk.bf16.gmra.mxu2 %vm199_vm9, %v739_v61  ;;  %v620_v61 = vld [vmem:[%s830_s2 + $0x58] sm:$0xff] }
 0x372   :  { %424 = vmatpush.bf16.msra.mxu3 %v620_v61 }
 0x3e4   :  { %v362_v54 = vpop.f32.mrf.mxu2 }
 0x3e5   :  { %v363_v60 = vadd.f32 %v362_v54, %v743_v2  ;;  %v619_v2 = vld [vmem:[%s830_s2 + $0x50] sm:$0xff] }
 0x3e6   :  { %425 = vmatpush.bf16.msra.mxu3 %v619_v2 }
 0x3e7   :  { %v371_v1 = vmax.f32 %v363_v60, 0.0 }
 0x3ec   :  { %v364_v55 = vpop.f32.mrf.mxu2 }
 0x3ed   :  { %v365_v58 = vadd.f32 %v364_v55, %v745_v3 }
 0x3ef   :  { %v372_v63 = vmax.f32 %v365_v58, 0.0 }
 0x3f1   :  { %v374_v37 = vpack.c.bf16 %v372_v63, %v371_v1 }
 0x3f4   :  { %v367_v56 = vpop.f32.mrf.mxu2 }
 0x3f5   :  { %v368_v57 = vadd.f32 %v367_v56, %v747_v4 }
 0x3f7   :  { %v373_v59 = vmax.f32 %v368_v57, 0.0 }
 0x3f9   :  { %v375_v62 = vpack.c.bf16 %v373_v59, %v373_v59 }
 0x3fb   :  { %v377_v0 = vsel %vm233_vm11, %v375_v62, 0 }
 0x3fc   :  { %v369_v5 = vpop.f32.mrf.mxu2  ;;  %385 = vmatpush.bf16.msra.mxu0 %v377_v0 }
 0x400   :  { %386 = vmatpush.bf16.msra.mxu0 %v374_v37 }
 0x403   :  { %584 = vmatmul.msk.bf16.vlgmr.msra.gmra.mxu0 %vm229_vm14, %v127_v24  ;;  %v624_v24 = vld [vmem:[%s832_s3 + $0x8] sm:$0xff] }
 0x404   :  { %463 = vmatpush.bf16.msrb.mxu0 %v622_v10  ;;  %530 = vmatpush.bf16.msra.mxu1 %v624_v24 }
 0x408   :  { %464 = vmatpush.bf16.msrb.mxu0 %v621_v11  ;;  %531 = vmatpush.bf16.msra.mxu1 %v623_v34 }
 0x480   :  { %v388_v3 = vpop.f32.mrf.mxu0 }
 0x481   :  { %v393_v6 = vadd.f32 %v388_v3, %v326_v51 }
 0x488   :  { %v390_v4 = vpop.f32.mrf.mxu0 }
 0x489   :  { %v394_v7 = vadd.f32 %v390_v4, %v328_v52 }
 0x48b   :  { %v395_v9 = vpack.c.bf16 %v394_v7, %v393_v6 }
 0x48d   :  { %593 = vmatmul.msk.bf16.vlgmr.msra.gmra.mxu3 %vm273_vm15, %v395_v9 }
 0x510   :  { %v427_v14 = vpop.f32.mrf.mxu3 }
 0x511   :  { %v428_v16 = vadd.f32 %v427_v14, %v402_v15 }
 0x513   :  { %v432_v19 = vmax.f32 %v428_v16, 0.0 }
 0x518   :  { %v429_v17 = vpop.f32.mrf.mxu3 }
 0x519   :  { %v430_v18 = vadd.f32 %v429_v17, %v402_v15 }
 0x51b   :  { %v433_v20 = vmax.f32 %v430_v18, 0.0 }
 0x51d   :  { %v434_v21 = vpack.c.bf16 %v433_v20, %v432_v19 }
 0x51f   :  { %602 = vmatmul.msk.bf16.vlgmr.msrb.gmra.mxu0 %vm273_vm15, %v434_v21 }
 0x59c   :  { %v466_v27 = vpop.f32.mrf.mxu0 }
 0x59d   :  { %v467_v32 = vadd.f32 %v466_v27, %v441_v30 }
 0x5a4   :  { %v468_v31 = vpop.f32.mrf.mxu0 }
 0x5a5   :  { %v469_v8 = vadd.f32 %v468_v31, %v441_v30 }
 0x5a7   :  { %v483_v33 = vpack.c.bf16 %v469_v8, %v467_v32 }
 0x5a9   :  { %494 = vmatpush.bf16.msrb.mxu3 %v483_v33 }
 0x5ac   :  { %604 = vmatmul.msk.bf16.vlgmr.msrb.gmra.mxu3 %vm199_vm9, %v482_v29 }
 0x62f   :  { %v496_v39 = vpop.f32.mrf.mxu3 }
 0x630   :  { %v500_v40 = vmul.f32 %v648_v38, %v496_v39 }
 0x632   :  { %v501_v41 = vpack.c.bf16 %v500_v40, %v500_v40 }
 0x634   :  { %613 = vmatmul.msk.bf16.vlgmr.msra.gmra.mxu1 %vm273_vm15, %v501_v41 }
 0x637   :  { %v498_v42 = vpop.f32.mrf.mxu3 }
 0x6b1   :  { %v533_v46 = vpop.f32.mrf.mxu1 }
 0x6b2   :  { %v534_v47 = vadd.f32 %v533_v46, %v508_v45 }
 0x6b4   :  { %537 = vst [vmem:[%s833_s4] sm:$0x3] %v534_v47 }
 0x6b9   :  { %v535_v48 = vpop.f32.mrf.mxu1 }

</bundles_post_ra>
